<compile_context>
chip_gen: v6e
topology: v6e:2x2x1
jax: 0.10.0
libtpu: 0.0.40
codegen_flags: <defaults>
</compile_context>

<pallas_src>
import functools

import jax
import jax.numpy as jnp
from jax import lax
from jax.experimental import pallas as pl
from jax.experimental.pallas import tpu as pltpu


# ----------------------------------------------------------------------------
# Parameter setup (deterministic, matches the module's __init__ formula)
# ----------------------------------------------------------------------------
def make_positional_encoding(seq_len: int, embed: int) -> jnp.ndarray:
    pos = jnp.arange(seq_len, dtype=jnp.float32)[:, None]          # (S, 1)
    i = jnp.arange(embed, dtype=jnp.float32)[None, :]               # (1, E)
    div = jnp.power(10000.0, jnp.floor(i / 2.0) * 2.0 / embed)      # (i//2*2)/embed
    angles = pos / div                                               # (S, E)
    even_mask = (jnp.arange(embed) % 2 == 0)[None, :]
    pe = jnp.where(even_mask, jnp.sin(angles), jnp.cos(angles))
    return pe.astype(jnp.float32)


# ----------------------------------------------------------------------------
# Stateless per-element hash (splitmix32-style): pure VPU int ops, portable.
# ----------------------------------------------------------------------------
def _hash_u32(x):
    x = x ^ (x >> 16)
    x = x * jnp.uint32(0x7FEB352D)
    x = x ^ (x >> 15)
    x = x * jnp.uint32(0x846CA68B)
    x = x ^ (x >> 16)
    return x


# ----------------------------------------------------------------------------
# Pallas kernel: out = dropout(x + pe)  on a (tb, tc) lane-dense tile
# ----------------------------------------------------------------------------
def _pe_add_dropout_kernel(seed_ref, x_ref, pe_ref, o_ref, *,
                           dropout_p: float, training: bool,
                           total_cols: int, tb: int, tc: int):
    x = x_ref[...].astype(jnp.float32)              # (tb, tc)
    pe = pe_ref[...].astype(jnp.float32)            # (1, tc) -> sublane broadcast
    out = x + pe

    if training and dropout_p > 0.0:
        c = pl.program_id(0)                        # column-tile index (outer)
        r = pl.program_id(1)                        # row-tile index (inner)
        row0 = (r * tb).astype(jnp.uint32)
        col0 = (c * tc).astype(jnp.uint32)
        rows = lax.broadcasted_iota(jnp.uint32, (tb, tc), 0) + row0
        cols = lax.broadcasted_iota(jnp.uint32, (tb, tc), 1) + col0
        # Global flat element index -> dropout mask is tiling-invariant.
        flat = rows * jnp.uint32(total_cols) + cols
        key = _hash_u32(seed_ref[0].astype(jnp.uint32))
        bits = _hash_u32(flat ^ key)
        # keep element iff uniform >= p  <=>  bits >= p * 2^32   (requires p < 1)
        threshold = jnp.uint32(min(int(round(dropout_p * (2.0 ** 32))), 2 ** 32 - 1))
        keep = bits >= threshold
        scale = jnp.float32(1.0 / (1.0 - dropout_p))
        out = jnp.where(keep, out * scale, jnp.float32(0.0))

    o_ref[...] = out.astype(o_ref.dtype)


# ----------------------------------------------------------------------------
# Wrapper
# ----------------------------------------------------------------------------
def _pick_tile(dim: int, unit: int, cap: int) -> int:
    """Largest tile <= cap that is a multiple of `unit`, or the full dim if small."""
    if dim <= unit:
        return dim                                   # full-extent block is always legal
    return max(unit, min(cap, (dim // unit) * unit))


def positional_encoding_forward(x: jnp.ndarray,
                                pe: jnp.ndarray,
                                *,
                                dropout_p: float = 0.1,
                                training: bool = False,
                                seed: int = 0) -> jnp.ndarray:
    """x: (B, S, E), pe: (S, E)."""
    B, S, E = x.shape
    assert pe.shape == (S, E)
    assert 0.0 <= dropout_p < 1.0, "dropout_p must be in [0, 1)"

    cols = S * E
    x2 = x.reshape(B, cols)                          # lane-dense 2-D slab
    pe2 = pe.reshape(1, cols).astype(jnp.float32)

    # Tile sizes: <= ~2 MiB f32 per block so 2x(x) + 2x(out) double buffers + pe
    # stay well inside the default scoped-VMEM budget on v5e/v6e/v7x.
    tb = _pick_tile(B, 8, 256)
    tc = _pick_tile(cols, 128, 2048)
    grid = (pl.cdiv(cols, tc), pl.cdiv(B, tb))       # (col tiles OUTER, row tiles inner)

    kernel = functools.partial(_pe_add_dropout_kernel,
                               dropout_p=float(dropout_p),
                               training=bool(training),
                               total_cols=cols, tb=tb, tc=tc)
    seed_arr = jnp.array([seed], dtype=jnp.int32)

    out2 = pl.pallas_call(
        kernel,
        out_shape=jax.ShapeDtypeStruct((B, cols), x.dtype),
        grid_spec=pltpu.PrefetchScalarGridSpec(
            num_scalar_prefetch=1,                   # seed -> SMEM
            grid=grid,
            in_specs=[
                pl.BlockSpec((tb, tc), lambda c, r, seed: (r, c)),
                # pe block index depends only on the OUTER grid axis -> stays
                # resident across the inner (row) axis, no redundant DMAs.
                pl.BlockSpec((1, tc), lambda c, r, seed: (0, c)),
            ],
            out_specs=pl.BlockSpec((tb, tc), lambda c, r, seed: (r, c)),
        ),
        compiler_params=pltpu.CompilerParams(
            # Stateless hash-based dropout -> no cross-step PRNG state, so both
            # axes can shard across TensorCores (v7x megacore).
            dimension_semantics=("parallel", "parallel"),
        ),
    )(seed_arr, x2, pe2)

    return out2.reshape(B, S, E)


# ----------------------------------------------------------------------------
# Demo / correctness check
# ----------------------------------------------------------------------------
if __name__ == "__main__":
    batch, seq_len, embed = 2, 8, 32
    dropout_p = 0.1

    key = jax.random.PRNGKey(0)
    x = jax.random.normal(key, (batch, seq_len, embed), dtype=jnp.float32)
    pe = make_positional_encoding(seq_len, embed)
    ref = x + pe[None, :, :]

    # Eval mode (dropout = identity): exact semantics out = x + pe.
    out_eval = positional_encoding_forward(x, pe, dropout_p=dropout_p,
                                           training=False)
    out_eval = jax.block_until_ready(out_eval)
    assert jnp.allclose(out_eval, ref, atol=1e-6), "eval-mode mismatch"

    # Training mode: in-kernel inverted dropout (deterministic seed).
    out_train = positional_encoding_forward(x, pe, dropout_p=dropout_p,
                                            training=True, seed=42)
    out_train = jax.block_until_ready(out_train)
    zero_mask = out_train == 0.0
    kept_ok = jnp.where(zero_mask, True,
                        jnp.isclose(out_train, ref / (1.0 - dropout_p), atol=1e-5))
    assert bool(jnp.all(kept_ok)), "train-mode dropout scaling mismatch"

    # Multi-tile case (exercises column tiling + resident pe reuse), eval mode.
    b2, s2, e2 = 16, 32, 128
    x2 = jax.random.normal(jax.random.PRNGKey(1), (b2, s2, e2), dtype=jnp.float32)
    pe2 = make_positional_encoding(s2, e2)
    out2 = jax.block_until_ready(
        positional_encoding_forward(x2, pe2, dropout_p=dropout_p, training=False))
    assert jnp.allclose(out2, x2 + pe2[None, :, :], atol=1e-6), "tiled eval mismatch"

    print("KERNEL_OK")
</pallas_src>

<mosaic_0001>
module attributes {stable_mosaic.version = 11 : i64} {
  func.func @_pe_add_dropout_kernel(%arg0: i32, %arg1: i32, %arg2: memref<1xi32, #tpu.memory_space<smem>>, %arg3: memref<2x256xf32, #tpu.memory_space<vmem>>, %arg4: memref<1x256xf32, #tpu.memory_space<vmem>>, %arg5: memref<2x256xf32, #tpu.memory_space<vmem>>) attributes {dimension_semantics = [#tpu.dimension_semantics<parallel>, #tpu.dimension_semantics<parallel>], iteration_bounds = array<i64: 1, 1>, scalar_prefetch = 1 : i64, scratch_operands = 0 : i64, tpu.core_type = #tpu.core_type<tc>, window_params = [{transform_indices = @transform_0, window_bounds = array<i64: 2, 256>}, {transform_indices = @transform_1, window_bounds = array<i64: 1, 256>}, {transform_indices = @transform_2, window_bounds = array<i64: 2, 256>}]} {
    %c0 = arith.constant 0 : index
    %c0_0 = arith.constant 0 : index
    %0 = vector.load %arg3[%c0, %c0_0] : memref<2x256xf32, #tpu.memory_space<vmem>>, vector<2x256xf32>
    %c0_1 = arith.constant 0 : index
    %c0_2 = arith.constant 0 : index
    %1 = vector.load %arg4[%c0_1, %c0_2] : memref<1x256xf32, #tpu.memory_space<vmem>>, vector<1x256xf32>
    %2 = vector.broadcast %1 : vector<1x256xf32> to vector<2x256xf32>
    %3 = arith.addf %0, %2 : vector<2x256xf32>
    %c0_3 = arith.constant 0 : index
    %c0_4 = arith.constant 0 : index
    %4 = vector.load %arg5[%c0_3, %c0_4] : memref<2x256xf32, #tpu.memory_space<vmem>>, vector<2x256xf32>
    tpu.vector_store %arg5[%c0_3, %c0_4], %3 {strides = array<i32>} : memref<2x256xf32, #tpu.memory_space<vmem>>, vector<2x256xf32>,
    return
  }
  func.func @transform_0(%arg0: i32, %arg1: i32, %arg2: memref<1xi32, #tpu.memory_space<smem>>) -> (i32, i32) {
    %c0_i32 = arith.constant 0 : i32
    return %arg1, %arg0 : i32, i32
  }
  func.func @transform_1(%arg0: i32, %arg1: i32, %arg2: memref<1xi32, #tpu.memory_space<smem>>) -> (i32, i32) {
    %c0_i32 = arith.constant 0 : i32
    %c0_i32_0 = arith.constant 0 : i32
    return %c0_i32, %arg0 : i32, i32
  }
  func.func @transform_2(%arg0: i32, %arg1: i32, %arg2: memref<1xi32, #tpu.memory_space<smem>>) -> (i32, i32) {
    %c0_i32 = arith.constant 0 : i32
    return %arg1, %arg0 : i32, i32
  }
}

</mosaic_0001>

<bundles_post_ra>
// kernel: tpu_custom_call.1
= control target key start
LH: loop header
LB: loop body
LE: loop exit
PB: predicated region body
PF: predicated region fallthrough
CT: control target
= control target key end

     0   :  { %9 = vsyncpa [#allocation5], 0  ;;  %s142_s0 = inlined_call_operand.<no memory space> [shape: s32[1], index: 0, kind: input, shape index: {}]   ;;  %s143_s1 = inlined_call_operand.hbm [shape: f32[2,256], index: 1, kind: input, shape index: {}]   ;;  %s144_s2 = inlined_call_operand.vmem [shape: f32[1,256], index: 2, kind: input, shape index: {}]   ;;  %s145_s3 = inlined_call_operand.hbm [shape: f32[2,256], index: 3, kind: output, shape index: {}]  }
   0x1   :  { %10 = vsyncpa [#allocation6], 0  ;;  %s110_s12 = smov [#allocation4]  }
   0x2   :  { %s17_s13 = sshll.u32 %s110_s12, 4  ;;  %s18_s13 = int_to_ptr.vmem [resolvable:$true] %s17_s13 }
   0x3   :  { %s74_s14 = scalar_lea.vmem %s18_s13, 64  ;;  %p79_p1 = scmp.lt.s32.totalorder %s18_s13, %s18_s13 }
   0x4   :  { %p75_p0 = scmp.ne.s32.totalorder %s18_s13, %s74_s14  ;;  %p80_p2 = scmp.lt.s32.totalorder %s74_s14, %s74_s14 }
   0x6   :  { %p81_p3 = por %p80_p2, %p79_p1 }
   0x8   :  { %p82_p4 = pnand %p81_p3, %p75_p0 }
   0xa   :  { %85 = shalt.err (!%p82_p4)
}
   0xb   :  { %20 = dma.hbm_to_vmem [thread:$0]  %s143_s1, 64, %s18_s13, [#allocation5]  }
   0xc   :  { %106 = dma.done.wait [#allocation5], 64  }
   0xd   :  { %107 = vsyncadd [#allocation5], 4294967232  ;;  %v29_v0 = vlaneseq  ;;  %v111_v1 = vmov 1983009808   ;;  %v27_v7 = vld [vmem:[%s144_s2] sm:$0x3] }
   0xe   :  { %v39_v2 = vunpack.c.l.s4 %v111_v1  ;;  %v26_v12 = vld [vmem:[#allocation4] sm:$0xf]  ;;  %s112_s18 = smov [#allocation7]  }
   0xf   :  { %v30_v3 = vshrl.u32 %v29_v0, 7  ;;  %s54_s1 = sshll.u32 %s112_s18, 4  ;;  %s55_s1 = int_to_ptr.vmem [resolvable:$true] %s54_s1 }
  0x10   :  { %v40_v6 = vunpack.c.0.s8 %v39_v2  ;;  %s86_s19 = scalar_lea.vmem %s55_s1, 64  ;;  %p91_p6 = scmp.lt.s32.totalorder %s55_s1, %s55_s1 }
  0x11   :  { %v31_v4 = vsub.s32 0, %v30_v3  ;;  %v35_v5 = vsub.s32 1, %v30_v3  ;;  %p87_p5 = scmp.ne.s32.totalorder %s55_s1, %s86_s19  ;;  %p92_p7 = scmp.lt.s32.totalorder %s86_s19, %s86_s19 }
  0x12   :  { %v43_v10 = vsub.s32 %v40_v6, %v30_v3 }
  0x13   :  { %v32_v8 = vrot.slane %v27_v7, %v31_v4  ;;  %v36_v9 = vrot.slane %v27_v7, %v35_v5  ;;  %p93_p8 = por %p92_p7, %p91_p6 }
  0x15   :  { %v37_v11 = vcombine.low %v32_v8, %v36_v9  ;;  %p94_p9 = pnand %p93_p8, %p87_p5 }
  0x17   :  { %v44_v13 = vrot.slane %v37_v11, %v43_v10 }
  0x19   :  { %v46_v14 = vadd.f32 %v44_v13, %v26_v12 }
  0x1b   :  { %47 = vst [vmem:[#allocation7] sm:$0xf] %v46_v14 }
  0x1c   :  { %97 = shalt.err (!%p94_p9)
}
  0x1d   :  { %57 = dma.vmem_to_hbm [thread:$0]  %s55_s1, 64, %s145_s3, [#allocation6]  }
  0x1e   :  { %108 = dma.done.wait [#allocation6], 64  }
  0x1f   :  { %109 = vsyncadd [#allocation6], 4294967232 }
  0x20   :  { %61 = vsyncpa [#allocation5], 1 }
  0x21   :  { %62 = vsyncpa [#allocation6], 1 }

</bundles_post_ra>
